<compile_context>
chip_gen: v6e
topology: v6e:2x2x1
jax: 0.10.0
libtpu: 0.0.40
codegen_flags: <defaults>
</compile_context>

<pallas_src>
import jax
import jax.numpy as jnp
import numpy as np
from jax.experimental import pallas as pl
from jax.experimental.pallas import tpu as pltpu


def _round_up(x, m):
    return (x + m - 1) // m * m


def bert_classifier_kernel(valid_len_ref, emb_ref, wp_ref, bp_ref, wc_ref, bc_ref,
                           out_ref, sum_acc, cnt_acc):
    """Grid = (B//TB, S//TS); S axis is the (arbitrary) reduction axis.

    valid_len_ref: [TB, 1]  int32
    emb_ref:       [TB, TS, H] bf16
    wp_ref/bp_ref: [H, H] bf16 / [1, H] f32        (pooler dense)
    wc_ref/bc_ref: [H, Cp] bf16 / [1, Cp] f32      (classifier, [in, out], C padded)
    out_ref:       [TB, Cp] f32
    sum_acc:       [TB, H] f32   (masked-sum accumulator, lives across S tiles)
    cnt_acc:       [TB, 1] f32   (valid-token count accumulator)
    """
    s_idx = pl.program_id(1)
    TB, TS, H = emb_ref.shape

    @pl.when(s_idx == 0)
    def _init():
        sum_acc[...] = jnp.zeros_like(sum_acc)
        cnt_acc[...] = jnp.zeros_like(cnt_acc)

    # gen_attention_mask for this sequence tile: mask[b, s] = 1 iff s < valid_length[b]
    vlen = valid_len_ref[...]                                            # [TB, 1] i32
    seq_pos = s_idx * TS + jax.lax.broadcasted_iota(jnp.int32, (TB, 1, TS), 2)
    mask = (seq_pos < vlen[:, :, None]).astype(emb_ref.dtype)            # [TB, 1, TS] bf16

    # Masked sum over the sequence tile on the MXU (bf16 inputs, f32 accumulation).
    emb = emb_ref[...]                                                   # [TB, TS, H] bf16
    part = jnp.einsum("bqs,bsh->bqh", mask, emb,
                      preferred_element_type=jnp.float32)                # [TB, 1, H] f32
    sum_acc[...] += part[:, 0, :]
    # Valid-token count for this tile: clamp(vlen - tile_start, 0, TS) — no reduction.
    cnt_acc[...] += jnp.clip(vlen - s_idx * TS, 0, TS).astype(jnp.float32)

    @pl.when(s_idx == pl.num_programs(1) - 1)
    def _finalize():
        denom = jnp.maximum(cnt_acc[...], 1.0)                           # [TB, 1]
        pooled = sum_acc[...] / denom                                    # [TB, H] f32
        # Synthetic BERT pooler stand-in: masked mean pool + tanh(dense).
        # TODO(synk): the full transformer encoder of `self.bert` is an external
        # module passed into __init__ and is not reproduced here.
        h = jnp.dot(pooled.astype(wp_ref.dtype), wp_ref[...],
                    preferred_element_type=jnp.float32) + bp_ref[...]
        pooler = jnp.tanh(h)                                             # [TB, H]
        # classifier: nn.Linear(hidden_size, num_classes) -> x @ W^T + b (W as [in, out])
        logits = jnp.dot(pooler.astype(wc_ref.dtype), wc_ref[...],
                         preferred_element_type=jnp.float32) + bc_ref[...]
        out_ref[...] = logits.astype(out_ref.dtype)


def init_params(key, vocab_size, hidden_size, num_classes):
    k1, k2, k3, k4 = jax.random.split(key, 4)
    scale = 0.02
    return {
        # synthetic embedding tables (stand-in for bert embeddings)
        "word_emb": scale * jax.random.normal(k1, (vocab_size, hidden_size), jnp.float32),
        "seg_emb":  scale * jax.random.normal(k2, (2, hidden_size), jnp.float32),
        # pooler dense (streamed bf16, f32 accumulation on MXU)
        "wp": (scale * jax.random.normal(k3, (hidden_size, hidden_size))).astype(jnp.bfloat16),
        "bp": jnp.zeros((1, hidden_size), jnp.float32),
        # classifier Linear(hidden_size, num_classes), stored as [in, out], bf16
        "wc": (scale * jax.random.normal(k4, (hidden_size, num_classes))).astype(jnp.bfloat16),
        "bc": jnp.zeros((1, num_classes), jnp.float32),
    }


def bert_classifier_forward(token_ids, valid_length, segment_ids, params,
                            block_b=None, block_s=None):
    # Embedding lookup stays as plain-JAX glue (gather).
    # TODO(synk): optionally fuse this gather into the kernel (token ids via scalar
    # prefetch + manual DMA gather) to halve HBM traffic on the dominant tensor.
    emb = params["word_emb"][token_ids] + params["seg_emb"][segment_ids]   # [B, S, H]
    emb = emb.astype(jnp.bfloat16)                                         # stream bf16
    B, S, H = emb.shape
    C = params["wc"].shape[1]
    C_pad = _round_up(C, 128)                                              # lane-dense out

    wc_pad = jnp.pad(params["wc"], ((0, 0), (0, C_pad - C)))
    bc_pad = jnp.pad(params["bc"], ((0, 0), (0, C_pad - C)))
    vlen2d = valid_length.astype(jnp.int32).reshape(B, 1)

    # ---- tile selection ----------------------------------------------------
    if block_b is None:
        block_b = B if B <= 8 else 8
    assert B % block_b == 0 and (block_b % 8 == 0 or block_b == B)

    if block_s is None:
        budget = 8 * 2**20  # double-buffered emb block budget (safe on v7x 64 MiB VMEM)
        block_s = S
        for d in range(min(S, 512), 0, -1):
            if S % d == 0 and (d % 8 == 0 or d == S):
                if 2 * block_b * d * H * emb.dtype.itemsize <= budget:
                    block_s = d
                    break
    assert S % block_s == 0 and (block_s % 8 == 0 or block_s == S)

    # ---- VMEM budget (double-buffered inputs/outputs + resident weights) ----
    emb_bytes = block_b * block_s * H * emb.dtype.itemsize
    weight_bytes = (H * H + H * C_pad) * 2 + (H + C_pad) * 4
    need = (2 * (emb_bytes + block_b * 4 + weight_bytes + block_b * C_pad * 4)
            + block_b * (H + 1) * 4)
    vmem_limit = int(min(max(2 * need, 16 * 2**20), 48 * 2**20))

    grid_spec = pltpu.PrefetchScalarGridSpec(
        num_scalar_prefetch=0,
        grid=(B // block_b, S // block_s),           # (batch, seq-reduction-last)
        in_specs=[
            pl.BlockSpec((block_b, 1), lambda b, s: (b, 0)),          # valid_length
            pl.BlockSpec((block_b, block_s, H), lambda b, s: (b, s, 0)),  # emb (streamed)
            pl.BlockSpec((H, H), lambda b, s: (0, 0)),                # wp (resident)
            pl.BlockSpec((1, H), lambda b, s: (0, 0)),                # bp (resident)
            pl.BlockSpec((H, C_pad), lambda b, s: (0, 0)),            # wc (resident)
            pl.BlockSpec((1, C_pad), lambda b, s: (0, 0)),            # bc (resident)
        ],
        out_specs=pl.BlockSpec((block_b, C_pad), lambda b, s: (b, 0)),
        scratch_shapes=[
            pltpu.VMEM((block_b, H), jnp.float32),   # masked-sum accumulator
            pltpu.VMEM((block_b, 1), jnp.float32),   # token-count accumulator
        ],
    )

    out_padded = pl.pallas_call(
        bert_classifier_kernel,
        out_shape=jax.ShapeDtypeStruct((B, C_pad), jnp.float32),
        grid_spec=grid_spec,
        compiler_params=pltpu.CompilerParams(
            dimension_semantics=("parallel", "arbitrary"),
            vmem_limit_bytes=vmem_limit),
    )(vlen2d, emb, params["wp"], params["bp"], wc_pad, bc_pad)

    return out_padded[:, :C]


def reference_forward(token_ids, valid_length, segment_ids, params):
    emb = (params["word_emb"][token_ids] + params["seg_emb"][segment_ids])
    emb = emb.astype(jnp.bfloat16).astype(jnp.float32)
    B, S, H = emb.shape
    mask = (jnp.arange(S)[None, :] < valid_length[:, None]).astype(jnp.float32)
    pooled = jnp.einsum("bs,bsh->bh", mask, emb) / jnp.maximum(
        mask.sum(1, keepdims=True), 1.0)
    pooler = jnp.tanh(pooled @ params["wp"].astype(jnp.float32) + params["bp"])
    return pooler @ params["wc"].astype(jnp.float32) + params["bc"]


if __name__ == "__main__":
    B, S, H, C, V = 2, 32, 128, 4, 100   # H multiple of 128 so lanes are real, not padding

    key = jax.random.PRNGKey(0)
    k_tok, k_seg, k_par = jax.random.split(key, 3)

    token_ids = jax.random.randint(k_tok, (B, S), 0, V, dtype=jnp.int32)
    segment_ids = jax.random.randint(k_seg, (B, S), 0, 2, dtype=jnp.int32)
    valid_length = jnp.array([11, 32], dtype=jnp.int32)   # partial + full rows

    params = init_params(k_par, V, H, C)

    # block_s=16 -> two sequence tiles, exercising the accumulate/finalize path.
    logits = bert_classifier_forward(token_ids, valid_length, segment_ids, params,
                                     block_s=16)
    jax.block_until_ready(logits)
    assert logits.shape == (B, C), logits.shape

    ref = reference_forward(token_ids, valid_length, segment_ids, params)
    np.testing.assert_allclose(np.asarray(logits), np.asarray(ref),
                               atol=2e-3, rtol=2e-2)
    print("KERNEL_OK")
</pallas_src>

<mosaic_0001>
module attributes {stable_mosaic.version = 11 : i64} {
  func.func @bert_classifier_kernel(%arg0: i32, %arg1: i32, %arg2: memref<2x1xi32, #tpu.memory_space<vmem>>, %arg3: memref<2x16x128xbf16, #tpu.memory_space<vmem>>, %arg4: memref<128x128xbf16, #tpu.memory_space<vmem>>, %arg5: memref<1x128xf32, #tpu.memory_space<vmem>>, %arg6: memref<128x128xbf16, #tpu.memory_space<vmem>>, %arg7: memref<1x128xf32, #tpu.memory_space<vmem>>, %arg8: memref<2x128xf32, #tpu.memory_space<vmem>>, %arg9: memref<2x128xf32, #tpu.memory_space<vmem>>, %arg10: memref<2x1xf32, #tpu.memory_space<vmem>>) attributes {dimension_semantics = [#tpu.dimension_semantics<parallel>, #tpu.dimension_semantics<arbitrary>], iteration_bounds = array<i64: 1, 2>, scalar_prefetch = 0 : i64, scratch_operands = 2 : i64, tpu.core_type = #tpu.core_type<tc>, window_params = [{transform_indices = @transform_0, window_bounds = array<i64: 2, 1>}, {transform_indices = @transform_1, window_bounds = array<i64: 2, 16, 128>}, {pipeline_mode = #tpu.pipeline_mode<synchronous>, transform_indices = @transform_2, window_bounds = array<i64: 128, 128>}, {pipeline_mode = #tpu.pipeline_mode<synchronous>, transform_indices = @transform_3, window_bounds = array<i64: 1, 128>}, {pipeline_mode = #tpu.pipeline_mode<synchronous>, transform_indices = @transform_4, window_bounds = array<i64: 128, 128>}, {pipeline_mode = #tpu.pipeline_mode<synchronous>, transform_indices = @transform_5, window_bounds = array<i64: 1, 128>}, {transform_indices = @transform_6, window_bounds = array<i64: 2, 128>}]} {
    %c0_i32 = arith.constant 0 : i32
    %0 = arith.cmpi eq, %arg1, %c0_i32 : i32
    %1 = arith.extui %0 : i1 to i32
    %c0_i32_0 = arith.constant 0 : i32
    %2 = arith.cmpi ne, %1, %c0_i32_0 : i32
    scf.if %2 {
      %cst_17 = arith.constant 0.000000e+00 : f32
      %34 = vector.broadcast %cst_17 : f32 to vector<2x128xf32>
      %c0_18 = arith.constant 0 : index
      %c0_19 = arith.constant 0 : index
      %35 = vector.load %arg9[%c0_18, %c0_19] : memref<2x128xf32, #tpu.memory_space<vmem>>, vector<2x128xf32>
      tpu.vector_store %arg9[%c0_18, %c0_19], %34 {strides = array<i32>} : memref<2x128xf32, #tpu.memory_space<vmem>>, vector<2x128xf32>,
      %cst_20 = arith.constant 0.000000e+00 : f32
      %36 = vector.broadcast %cst_20 : f32 to vector<2x1xf32>
      %c0_21 = arith.constant 0 : index
      %c0_22 = arith.constant 0 : index
      %37 = vector.load %arg10[%c0_21, %c0_22] : memref<2x1xf32, #tpu.memory_space<vmem>>, vector<2x1xf32>
      tpu.vector_store %arg10[%c0_21, %c0_22], %36 {strides = array<i32>} : memref<2x1xf32, #tpu.memory_space<vmem>>, vector<2x1xf32>,
    } else {
    }
    %c0 = arith.constant 0 : index
    %c0_1 = arith.constant 0 : index
    %3 = vector.load %arg2[%c0, %c0_1] : memref<2x1xi32, #tpu.memory_space<vmem>>, vector<2x1xi32>
    %c16_i32 = arith.constant 16 : i32
    %4 = arith.muli %arg1, %c16_i32 : i32
    %5 = tpu.iota {dimensions = array<i32: 2>} : vector<2x1x16xi32>
    %6 = vector.broadcast %4 : i32 to vector<2x1x16xi32>
    %7 = arith.addi %6, %5 : vector<2x1x16xi32>
    %8 = vector.shape_cast %3 : vector<2x1xi32> to vector<2x1x1xi32>
    %9 = vector.broadcast %8 : vector<2x1x1xi32> to vector<2x1x16xi32>
    %10 = arith.cmpi slt, %7, %9 : vector<2x1x16xi32>
    %11 = arith.extui %10 : vector<2x1x16xi1> to vector<2x1x16xi32>
    %12 = arith.sitofp %11 : vector<2x1x16xi32> to vector<2x1x16xf32>
    %13 = arith.truncf %12 : vector<2x1x16xf32> to vector<2x1x16xbf16>
    %c0_2 = arith.constant 0 : index
    %c0_3 = arith.constant 0 : index
    %c0_4 = arith.constant 0 : index
    %14 = vector.load %arg3[%c0_2, %c0_3, %c0_4] : memref<2x16x128xbf16, #tpu.memory_space<vmem>>, vector<2x16x128xbf16>
    "tpu.trace_start"() <{level = 10 : i32, message = "bqs,bsh->bqh"}> : () -> ()
    %cst = arith.constant dense<0.000000e+00> : vector<2x1x128xf32>
    %15 = tpu.matmul %13, %14, %cst {dimension_numbers = #tpu.dot_dimension_numbers<[2], [1], [1], [2], [0, 0, 0, 1, 1, 2], [0], [0]>} : vector<2x1x16xbf16>, vector<2x16x128xbf16>, vector<2x1x128xf32> -> vector<2x1x128xf32>
    "tpu.trace_stop"() : () -> ()
    %c0_5 = arith.constant 0 : index
    %c0_6 = arith.constant 0 : index
    %16 = vector.load %arg9[%c0_5, %c0_6] : memref<2x128xf32, #tpu.memory_space<vmem>>, vector<2x128xf32>
    %17 = vector.shape_cast %15 : vector<2x1x128xf32> to vector<2x128xf32>
    %18 = arith.addf %16, %17 : vector<2x128xf32>
    %c0_7 = arith.constant 0 : index
    %c0_8 = arith.constant 0 : index
    %19 = vector.load %arg9[%c0_7, %c0_8] : memref<2x128xf32, #tpu.memory_space<vmem>>, vector<2x128xf32>
    tpu.vector_store %arg9[%c0_7, %c0_8], %18 {strides = array<i32>} : memref<2x128xf32, #tpu.memory_space<vmem>>, vector<2x128xf32>,
    %c0_9 = arith.constant 0 : index
    %c0_10 = arith.constant 0 : index
    %20 = vector.load %arg10[%c0_9, %c0_10] : memref<2x1xf32, #tpu.memory_space<vmem>>, vector<2x1xf32>
    %c16_i32_11 = arith.constant 16 : i32
    %21 = arith.muli %arg1, %c16_i32_11 : i32
    %22 = vector.broadcast %21 : i32 to vector<2x1xi32>
    %23 = arith.subi %3, %22 : vector<2x1xi32>
    %c0_i32_12 = arith.constant 0 : i32
    %c16_i32_13 = arith.constant 16 : i32
    %24 = vector.broadcast %c0_i32_12 : i32 to vector<2x1xi32>
    %25 = arith.maxsi %24, %23 : vector<2x1xi32>
    %26 = vector.broadcast %c16_i32_13 : i32 to vector<2x1xi32>
    %27 = arith.minsi %26, %25 : vector<2x1xi32>
    %28 = arith.sitofp %27 : vector<2x1xi32> to vector<2x1xf32>
    %29 = arith.addf %20, %28 : vector<2x1xf32>
    %c0_14 = arith.constant 0 : index
    %c0_15 = arith.constant 0 : index
    %30 = vector.load %arg10[%c0_14, %c0_15] : memref<2x1xf32, #tpu.memory_space<vmem>>, vector<2x1xf32>
    tpu.vector_store %arg10[%c0_14, %c0_15], %29 {strides = array<i32>} : memref<2x1xf32, #tpu.memory_space<vmem>>, vector<2x1xf32>,
    %c1_i32 = arith.constant 1 : i32
    %31 = arith.cmpi eq, %arg1, %c1_i32 : i32
    %32 = arith.extui %31 : i1 to i32
    %c0_i32_16 = arith.constant 0 : i32
    %33 = arith.cmpi ne, %32, %c0_i32_16 : i32
    scf.if %33 {
      %c0_17 = arith.constant 0 : index
      %c0_18 = arith.constant 0 : index
      %34 = vector.load %arg10[%c0_17, %c0_18] : memref<2x1xf32, #tpu.memory_space<vmem>>, vector<2x1xf32>
      %cst_19 = arith.constant 1.000000e+00 : f32
      %35 = vector.broadcast %cst_19 : f32 to vector<2x1xf32>
      %36 = arith.maximumf %34, %35 : vector<2x1xf32>
      %c0_20 = arith.constant 0 : index
      %c0_21 = arith.constant 0 : index
      %37 = vector.load %arg9[%c0_20, %c0_21] : memref<2x128xf32, #tpu.memory_space<vmem>>, vector<2x128xf32>
      %38 = vector.broadcast %36 : vector<2x1xf32> to vector<2x128xf32>
      %39 = arith.divf %37, %38 : vector<2x128xf32>
      %40 = arith.truncf %39 : vector<2x128xf32> to vector<2x128xbf16>
      %c0_22 = arith.constant 0 : index
      %c0_23 = arith.constant 0 : index
      %41 = vector.load %arg4[%c0_22, %c0_23] : memref<128x128xbf16, #tpu.memory_space<vmem>>, vector<128x128xbf16>
      %cst_24 = arith.constant dense<0.000000e+00> : vector<2x128xf32>
      %42 = tpu.matmul %40, %41, %cst_24 {dimension_numbers = #tpu.dot_dimension_numbers<[1], [0], [0], [1], [0, 0, 1, 1], [], []>} : vector<2x128xbf16>, vector<128x128xbf16>, vector<2x128xf32> -> vector<2x128xf32>
      %c0_25 = arith.constant 0 : index
      %c0_26 = arith.constant 0 : index
      %43 = vector.load %arg5[%c0_25, %c0_26] : memref<1x128xf32, #tpu.memory_space<vmem>>, vector<1x128xf32>
      %44 = vector.broadcast %43 : vector<1x128xf32> to vector<2x128xf32>
      %45 = arith.addf %42, %44 : vector<2x128xf32>
      %46 = math.tanh %45 : vector<2x128xf32>
      %47 = arith.truncf %46 : vector<2x128xf32> to vector<2x128xbf16>
      %c0_27 = arith.constant 0 : index
      %c0_28 = arith.constant 0 : index
      %48 = vector.load %arg6[%c0_27, %c0_28] : memref<128x128xbf16, #tpu.memory_space<vmem>>, vector<128x128xbf16>
      %cst_29 = arith.constant dense<0.000000e+00> : vector<2x128xf32>
      %49 = tpu.matmul %47, %48, %cst_29 {dimension_numbers = #tpu.dot_dimension_numbers<[1], [0], [0], [1], [0, 0, 1, 1], [], []>} : vector<2x128xbf16>, vector<128x128xbf16>, vector<2x128xf32> -> vector<2x128xf32>
      %c0_30 = arith.constant 0 : index
      %c0_31 = arith.constant 0 : index
      %50 = vector.load %arg7[%c0_30, %c0_31] : memref<1x128xf32, #tpu.memory_space<vmem>>, vector<1x128xf32>
      %51 = vector.broadcast %50 : vector<1x128xf32> to vector<2x128xf32>
      %52 = arith.addf %49, %51 : vector<2x128xf32>
      %c0_32 = arith.constant 0 : index
      %c0_33 = arith.constant 0 : index
      %53 = vector.load %arg8[%c0_32, %c0_33] : memref<2x128xf32, #tpu.memory_space<vmem>>, vector<2x128xf32>
      tpu.vector_store %arg8[%c0_32, %c0_33], %52 {strides = array<i32>} : memref<2x128xf32, #tpu.memory_space<vmem>>, vector<2x128xf32>,
    } else {
    }
    return
  }
  func.func @transform_0(%arg0: i32, %arg1: i32) -> (i32, i32) {
    %c0_i32 = arith.constant 0 : i32
    %c0_i32_0 = arith.constant 0 : i32
    return %arg0, %c0_i32 : i32, i32
  }
  func.func @transform_1(%arg0: i32, %arg1: i32) -> (i32, i32, i32) {
    %c0_i32 = arith.constant 0 : i32
    %c0_i32_0 = arith.constant 0 : i32
    return %arg0, %arg1, %c0_i32 : i32, i32, i32
  }
  func.func @transform_2(%arg0: i32, %arg1: i32) -> (i32, i32) {
    %c0_i32 = arith.constant 0 : i32
    %c0_i32_0 = arith.constant 0 : i32
    %c0_i32_1 = arith.constant 0 : i32
    return %c0_i32, %c0_i32_0 : i32, i32
  }
  func.func @transform_3(%arg0: i32, %arg1: i32) -> (i32, i32) {
    %c0_i32 = arith.constant 0 : i32
    %c0_i32_0 = arith.constant 0 : i32
    %c0_i32_1 = arith.constant 0 : i32
    return %c0_i32, %c0_i32_0 : i32, i32
  }
  func.func @transform_4(%arg0: i32, %arg1: i32) -> (i32, i32) {
    %c0_i32 = arith.constant 0 : i32
    %c0_i32_0 = arith.constant 0 : i32
    %c0_i32_1 = arith.constant 0 : i32
    return %c0_i32, %c0_i32_0 : i32, i32
  }
  func.func @transform_5(%arg0: i32, %arg1: i32) -> (i32, i32) {
    %c0_i32 = arith.constant 0 : i32
    %c0_i32_0 = arith.constant 0 : i32
    %c0_i32_1 = arith.constant 0 : i32
    return %c0_i32, %c0_i32_0 : i32, i32
  }
  func.func @transform_6(%arg0: i32, %arg1: i32) -> (i32, i32) {
    %c0_i32 = arith.constant 0 : i32
    %c0_i32_0 = arith.constant 0 : i32
    return %arg0, %c0_i32 : i32, i32
  }
}

</mosaic_0001>

<bundles_post_ra>
// kernel: tpu_custom_call.1
= control target key start
LH: loop header
LB: loop body
LE: loop exit
PB: predicated region body
PF: predicated region fallthrough
CT: control target
= control target key end

     0   :  { %s1493_s0 = inlined_call_operand.vmem [shape: s32[2,1], index: 0, kind: input, shape index: {}]   ;;  %s1494_s1 = inlined_call_operand.hbm [shape: bf16[2,32,128], index: 1, kind: input, shape index: {}]   ;;  %s1495_s2 = inlined_call_operand.hbm [shape: bf16[128,128], index: 2, kind: input, shape index: {}]   ;;  %s1496_s3 = inlined_call_operand.vmem [shape: f32[1,128], index: 3, kind: input, shape index: {}]   ;;  %s1497_s4 = inlined_call_operand.hbm [shape: bf16[128,128], index: 4, kind: input, shape index: {}]   ;;  %s1498_s5 = inlined_call_operand.vmem [shape: f32[1,128], index: 5, kind: input, shape index: {}]   ;;  %s1499_s6 = inlined_call_operand.hbm [shape: f32[2,128], index: 6, kind: output, shape index: {}]  }
   0x1   :  { %1504 = sst [smem:[#allocation17_spill]] %s1495_s2 }
   0x2   :  { %11 = vsyncpa [#allocation5], 0 }
   0x3   :  { %13 = vsyncpa [#allocation5 + $0x1], 0 }
   0x4   :  { %14 = vsyncpa [#allocation8], 0 }
   0x5   :  { %15 = vsyncpa [#allocation6], 0  ;;  %s1316_s21 = smov 0   ;;  %s1318_s22 = smov 0  }
   0x6   :  { %s1320_s23 = smov 0   ;;  %s1322_s24 = smov 0  }
   0x7   :  { %s1324_s25 = smov 0   ;;  %s1326_s26 = smov 0  }
   0x8 LB: > { %s1503_s27 = sadd.s32 4294967295, %s1260_s26   ;;  %s30_s28 = sadd.s32 1, %s1256_s25  ;;  %s1260_s26 = sphi %s1326_s26, %s21_s26   ;;  %s1256_s25 = sphi %s1324_s25, %s1519_s25   ;;  %s1252_s24 = sphi %s1322_s24, %s1518_s24   ;;  %s1248_s23 = sphi %s1320_s23, %s1517_s23   ;;  %s1244_s22 = sphi %s1318_s22, %s1516_s22   ;;  %s1240_s21 = sphi %s1316_s21, %s1515_s21  }
   0x9   : > { %p31_p0 = scmp.ge.s32.totalorder %s30_s28, 2  ;;  %s68_s29 = sadd.s32 1, %s1248_s23 }
   0xa   : > { %p75_p1 = scmp.ne.s32.totalorder %s1248_s23, %s1244_s22  ;;  %p76_p2 = scmp.eq.s32.totalorder %s1260_s26, 0 }
   0xb   : > { %s1521_s28 = smov (%p31_p0, %s30_s28), 0  ;;  %p81_p4 = scmp.ne.s32.totalorder %s1244_s22, %s1240_s21 }
   0xc   : > { %p1352_p3 = por %p76_p2, %p75_p1  ;;  %s64_s7 = ssub.s32 %s1256_s25, %s1521_s28 }
   0xd   : > { %p1361_p5 = scmp.eq.s32.totalorder %s1503_s27, 0  ;;  %p66_p6 = scmp.eq.s32.totalorder %s64_s7, 0 }
   0xe   : > { %p881_p7 = scmp.ge.s32.totalorder %s1260_s26, 1  ;;  %p202_p9 = scmp.lt.s32.totalorder %s1260_s26, 3 }
   0xf   : > { %s1506_s8 = scalar_select %p1361_p5, 1, 0 }
  0x10   : > { %p1368_p8 = por %p1361_p5, %p81_p4  ;;  %p1376_p10 = pnand %p881_p7, %p202_p9 }
  0x11   : > { %s1374_s10 = scalar_select %p66_p6, %s1248_s23, %s68_s29  }
  0x12   : > { %s1507_s9 = scalar_select %p1368_p8, 1, 0 }
  0x13   : > { %p1022_p11 = pneg %p1376_p10  ;;  %s1262_s12 = smov [#allocation7]  }
  0x14   : > { %s221_s13 = sshll.u32 %s1262_s12, 4  ;;  %s1263_s15 = smov [#allocation9]   ;;  %s222_s13 = int_to_ptr.vmem [resolvable:$true] %s221_s13 }
  0x15   : > { %p1384_p12 = pnand %p1022_p11, %p1361_p5  ;;  %s237_s16 = sshll.u32 %s1263_s15, 4  ;;  %s238_s16 = int_to_ptr.vmem [resolvable:$true] %s237_s16 }
  0x16   : > { %s1137_s17 = scalar_lea.vmem %s222_s13, 1024  ;;  %p1145_p4 = scmp.lt.s32.totalorder %s222_s13, %s222_s13 }
  0x17   : > { %p1128_p13 = pneg %p1384_p12  ;;  %p1138_p0 = scmp.ne.s32.totalorder %s222_s13, %s1137_s17 }
  0x18   : > { %p1146_p6 = scmp.lt.s32.totalorder %s1137_s17, %s1137_s17 }
  0x19   : > { %p1140_p1 = pnand %p1138_p0, %p1128_p13 }
  0x1a   : > { %p1147_p7 = por %p1146_p6, %p1145_p4 }
  0x1b   : > { %p1141_p2 = pneg %p1140_p1 }
  0x1d   : > { %p1148_p9 = pnand %p1147_p7, %p1141_p2 }
  0x1f   : > { %1151 = shalt.err (!%p1148_p9)
}
  0x20   : > { %s1264_s18 = smov 64   ;;  %s1265_s19 = smov 4  }
  0x21   : > { %s1510_s2 = sld [smem:[#allocation17_spill]]  ;;  %s1163_s29 = scalar_lea.vmem %s238_s16, 1024 }
  0x22   : > { %p1164_p11 = scmp.ne.s32.totalorder %s238_s16, %s1163_s29  ;;  %p1171_p5 = scmp.lt.s32.totalorder %s238_s16, %s238_s16 }
  0x23   : > { %p1172_p8 = scmp.lt.s32.totalorder %s1163_s29, %s1163_s29 }
  0x24   : > { %p1166_p0 = pnand %p1164_p11, %p1128_p13 }
  0x25   : > { %p1173_p4 = por %p1172_p8, %p1171_p5 }
  0x26   : > { %p1167_p1 = pneg %p1166_p0 }
  0x27   : > { %1025 = dma.hbm_to_vmem [thread:$0]  (!%p1384_p12), %s1510_s2, 1024, %s222_s13, [#allocation8], %s1264_s18, %s1264_s18, %s1265_s19  }
  0x28   : > { %p1174_p2 = pnand %p1173_p4, %p1167_p1 }
  0x2a   : > { %1177 = shalt.err (!%p1174_p2)
}
  0x2b   : > { %1028 = dma.hbm_to_vmem [thread:$0]  (!%p1384_p12), %s1497_s4, 1024, %s238_s16, [#allocation8], %s1264_s18, %s1264_s18, %s1265_s19  }
  0x2c   : > { %p885_p6 = scmp.ge.s32.totalorder %s1260_s26, 2 }
  0x2e   : > { %250 = sbr.rel (%p885_p6) target bundleno = 64 (0x40), region = 36 }
  0x33   : > { %s254_s13 = sand.u32 1, %s1248_s23   ;;  %s926_s15 = sshll.u32 %s1256_s25, 7 }
  0x34   : > { %s886_s17 = sshll.u32 %s254_s13, 4  ;;  %s267_s21 = scalar_lea.hbm %s1494_s1, %s926_s15 }
  0x35   : > { %s1005_s16 = scalar_select %p1352_p3, [#allocation0], [#allocation13] }
  0x36   : > { %s258_s18 = scalar_lea.vmem [#allocation4], %s886_s17  ;;  %s1266_s7 = smov 256  }
  0x37   : > { %s280_s19 = sshll.u32 %s258_s18, 4  ;;  %s272_s29 = sld [smem:[%s1005_s16]]   ;;  %s281_s19 = int_to_ptr.vmem [resolvable:$true] %s280_s19 }
  0x38   : > { %1006 = sst [smem:[#allocation12]] (%p1352_p3), %s1266_s7  ;;  %s1267_s12 = smov 128  }
  0x39   : > { %1007 = sst [smem:[#allocation12 + $0x1]] (%p1352_p3), %s1267_s12  ;;  %s1268_s27 = smov 2  }
  0x3a   : > { %1008 = sst [smem:[#allocation12 + $0x2]] (%p1352_p3), %s1268_s27  ;;  %s1269_s2 = smov 64  }
  0x3b   : > { %1009 = sst [smem:[#allocation12 + $0x3]] (%p1352_p3), %s1269_s2  ;;  %s1270_s17 = smov 4  }
  0x3c   : > { %1010 = sst [smem:[#allocation12 + $0x4]] (%p1352_p3), %s1269_s2  ;;  %s255_s14 = scalar_lea.sflag [#allocation5], %s254_s13 }
  0x3d   : > { %s889_s15 = sshll.u32 %s272_s29, 26  ;;  %1011 = sst [smem:[#allocation12 + $0x5]] (%p1352_p3), %s1270_s17 }
  0x3e   : > { %s890_s20 = sadd.s32 134217728, %s889_s15  ;;  %s1271_s16 = smov 131072  }
  0x3f   : > { %1012 = dma.general (%p1352_p3), %s267_s21, 256, %s281_s19, %s255_s14, %s1271_s16, [#allocation12], %s890_s20, 0  }
  0x40 PF: > { %305 = sbr.rel (%p1376_p10) target bundleno = 996 (0x3e4), region = 44  ;;  %s307_s27 = sand.u32 (!%p1376_p10), 1, %s1244_s22  }
  0x41   : > { %s1431_s18 = sshll.u32 (!%p1376_p10), %s307_s27, 4  ;;  %s308_s2 = scalar_lea.sflag (!%p1376_p10), [#allocation5], %s307_s27 }
  0x42   : > { %s311_s29 = scalar_lea.vmem (!%p1376_p10), [#allocation4], %s1431_s18  ;;  %p1511_p5 = scmp.ne.s32.totalorder (!%p1376_p10), %s1507_s9, 0 }
  0x45   : > { %1227 = dma.done.wait (%p1511_p5), %s308_s2, 256  }
  0x46   : > { %1229 = vsyncadd (%p1511_p5), %s308_s2, 4294967040  ;;  %p1512_p8 = scmp.ne.s32.totalorder %s1506_s8, 0 }
  0x48   : > { %1231 = dma.done.wait (%p1512_p8), [#allocation8], 2048  }
  0x49   : > { %1233 = vsyncadd (%p1512_p8), [#allocation8], 4294965248  ;;  %p895_p3 = scmp.ne.s32.totalorder %s1252_s24, 0 }
  0x4b   : > { %357 = sbr.rel (%p895_p3) target bundleno = 82 (0x52), region = 60 }
  0x50   : > { %vm359_vm0 = vcmask 1024   ;;  %v1272_v0 = vmov 0.0  }
  0x51   : > { %358 = vst [vmem:[#allocation2] sm:$0x3] %v1272_v0  ;;  %360 = vst.msk [vmem:[#allocation3] sm:$0x3] %vm359_vm0, %v1272_v0 }
  0x52 PF: > { %s896_s30 = sshll.u32 %s1252_s24, 4  ;;  %v363_v1 = vlaneseq  ;;  %v1273_v2 = vmov 0   ;;  %v361_v3 = vld [vmem:[%s1493_s0] sm:$0x3]  ;;  %v1274_v5 = vmov 1966171168  }
  0x53   : > { %1102 = vset.pattern.permute.xlu0 %v1273_v2  ;;  %v365_v4 = vstv %s896_s30  ;;  %v368_v6 = vunpack.c.l.s4 %v1274_v5  ;;  %v1275_v10 = vmov 0.0   ;;  %v1103_v19 = vld [vmem:[%s311_s29] sm:$0xff]   ;;  %vm531_vm3 = vcmask 1024   ;;  %v1104_v24 = vld [vmem:[%s311_s29 + $0x8] sm:$0xff]   ;;  %p903_p10 = scmp.ne.s32.totalorder %s1252_s24, 1 }
  0x54   : > { %v371_v7 = vshrl.u32 %v363_v1, 7  ;;  %v524_v8 = vsub.s32 %v361_v3, %v365_v4  ;;  %v364_v9 = vand.u32 127, %v363_v1  ;;  %949 = vmatprep.subr.bf16.mxu0 %v1275_v10  ;;  %955 = vmatprep.subr.bf16.mxu1 %v1275_v10  ;;  %vm1276_vm4 = vmmov 0  }
  0x55   : > { %v369_v11 = vunpack.c.0.s8 %v368_v6  ;;  %950 = vmatpush3.bf16.msra.mxu0 %v1103_v19  ;;  %951 = vmatprep.mubr.msk.bf16.mxu0 %vm1276_vm4, %v1275_v10  ;;  %vm421_vm6 = vcmask 130048   ;;  %vm518_vm8 = vcmask 1041409  }
  0x56   : > { %vm525_vm1 = vcmp.gt.s32.totalorder %v524_v8, 0  ;;  %v366_v12 = vadd.s32 %v365_v4, %v364_v9  ;;  %957 = vmatprep.mubr.msk.bf16.mxu1 %vm1276_vm4, %v1275_v10  ;;  %956 = vmatpush3.bf16.msra.mxu1 %v1104_v24  ;;  %v394_v25 = vsub.s32 0, %v371_v7 }
  0x57   : > { %v372_v13 = vsub.s32 %v369_v11, %v371_v7  ;;  %v526_v14 = vsel %vm525_vm1, %v524_v8, 0 }
  0x58   : > { %vm527_vm2 = vcmp.lt.s32.totalorder %v526_v14, 16  ;;  %v523_v16 = vld [vmem:[#allocation3] sm:$0x3]  ;;  %v514_v38 = vld [vmem:[#allocation2] sm:$0x3] }
  0x59   : > { %v373_v15 = vrot.slane %v361_v3, %v372_v13  ;;  %v528_v17 = vsel %vm527_vm2, %v526_v14, 16 }
  0x5a   : > { %v529_v18 = vcvt.s32.f32 %v528_v17 }
  0x5b   : > { %v381_v20 = vrot.slane %v373_v15, %v372_v13  ;;  %v374_v21 = vcombine.high %v373_v15, %v373_v15 }
  0x5c   : > { %v530_v22 = vadd.f32 %v529_v18, %v523_v16 }
  0x5d   : > { %390 = vperm.xlu0 %1102, %v381_v20   ;;  %v388_v23 = vrot.slane %v374_v21, %v372_v13 }
  0x5e   : > { %532 = vst.msk [vmem:[#allocation3] sm:$0x3] %vm531_vm3, %v530_v22 }
  0x61   : > { %397 = vperm.xlu0 %1102, %v388_v23  }
  0xd8   : > { %v391_v26 = vpop.permute.xlu0 %390 }
  0xd9   : > { %v395_v27 = vrot.slane %v391_v26, %v394_v25 }
  0xdb   : > { %vm403_vm5 = vcmp.lt.s32.totalorder %v366_v12, %v395_v27 }
  0xdc   : > { %v897_v28 = vsel %vm403_vm5, 1.0, %v1275_v10  ;;  %v398_v29 = vpop.permute.xlu0 %397 }
  0xdd   : > { %v409_v30 = vpack.c.bf16 %v897_v28, %v897_v28  ;;  %v402_v31 = vrot.slane %v398_v29, %v394_v25 }
  0xdf   : > { %vm404_vm7 = vcmp.lt.s32.totalorder %v366_v12, %v402_v31  ;;  %952 = vmatmul.mubr.msk.bf16.vlgmr.msra.gmra.mxu0 %vm421_vm6, %v409_v30 }
  0xe0   : > { %v898_v32 = vsel %vm404_vm7, 1.0, %v1275_v10 }
  0xe1   : > { %v410_v33 = vpack.c.bf16 %v898_v32, %v898_v32 }
  0xe3   : > { %958 = vmatmul.mubr.msk.bf16.vlgmr.msra.gmra.mxu1 %vm421_vm6, %v410_v33 }
 0x19f   : > { %v459_v34 = vpop.f32.mrf.mxu0 }
 0x1a1   : > { %v953_v35 = vpop.f32.mrf.mxu0 }
 0x1a3   : > { %v462_v36 = vpop.f32.mrf.mxu0  ;;  %v508_v37 = vpop.f32.mrf.mxu1 }
 0x1a4   : > { %v517_v39 = vrot.slane %v508_v37, 7 }
 0x1a5   : > { %v954_v40 = vpop.f32.mrf.mxu0  ;;  %v959_v41 = vpop.f32.mrf.mxu1  ;;  %536 = sbr.rel (%p903_p10) target bundleno = 981 (0x3d5), region = 64 }
 0x1a6   : > { %v519_v42 = vsel %vm518_vm8, %v517_v39, %v459_v34 }
 0x1a7   : > { %v521_v43 = vadd.f32 %v519_v42, %v514_v38  ;;  %v511_v44 = vpop.f32.mrf.mxu1 }
 0x1a9   : > { %522 = vst [vmem:[#allocation2] sm:$0x3] %v521_v43  ;;  %v960_v45 = vpop.f32.mrf.mxu1 }
 0x1aa   : > { %v537_v46 = vld [vmem:[#allocation3] sm:$0x3]  ;;  %v1277_v47 = vmov 0   ;;  %v1278_v49 = vmov 0.0   ;;  %v1107_v51 = vld [vmem:[#allocation7 + $0x30] sm:$0xff]   ;;  %vm1279_vm9 = vmmov 0  }
 0x1ab   : > { %1105 = vset.pattern.permute.xlu0 %v1277_v47  ;;  %v538_v48 = vmax.f32 %v537_v46, 1.0  ;;  %961 = vmatprep.subr.bf16.mxu0 %v1278_v49  ;;  %v1106_v50 = vld [vmem:[#allocation7 + $0x38] sm:$0xff]   ;;  %v1108_v52 = vld [vmem:[#allocation7 + $0x28] sm:$0xff]   ;;  %v1109_v53 = vld [vmem:[#allocation7 + $0x20] sm:$0xff]  }
 0x1ac   : > { %981 = vmatprep.subr.bf16.mxu1 %v1278_v49  ;;  %962 = vmatpush3.bf16.msra.mxu0 %v1106_v50  ;;  %v1110_v54 = vld [vmem:[#allocation7 + $0x18] sm:$0xff]   ;;  %v1111_v56 = vld [vmem:[#allocation7 + $0x10] sm:$0xff]   ;;  %v1112_v58 = vld [vmem:[#allocation7 + $0x8] sm:$0xff]  }
 0x1ad   : > { %542 = vperm.xlu0 %1105, %v538_v48   ;;  %963 = vmatprep.subr.bf16.mxu0 %v1278_v49  ;;  %v1114_v55 = vld [vmem:[#allocation9 + $0x38] sm:$0xff]   ;;  %v1115_v57 = vld [vmem:[#allocation9 + $0x30] sm:$0xff]   ;;  %v1116_v59 = vld [vmem:[#allocation9 + $0x28] sm:$0xff]  }
 0x1ae   : > { %977 = vmatprep.mubr.msk.bf16.mxu0 %vm1279_vm9, %v1278_v49  ;;  %997 = vmatprep.mubr.msk.bf16.mxu1 %vm1279_vm9, %v1278_v49  ;;  %v1113_v60 = vld [vmem:[#allocation7] sm:$0xff]   ;;  %v1118_v3 = vld [vmem:[#allocation9 + $0x18] sm:$0xff]   ;;  %v1119_v4 = vld [vmem:[#allocation9 + $0x10] sm:$0xff]  }
 0x1af   : > { %982 = vmatpush3.bf16.msra.mxu1 %v1114_v55  ;;  %v1117_v2 = vld [vmem:[#allocation9 + $0x20] sm:$0xff]   ;;  %v1120_v5 = vld [vmem:[#allocation9 + $0x8] sm:$0xff]   ;;  %v904_v7 = vld [vmem:[%s1496_s3] ss:$0 sm:$0xff] }
 0x1b0   : > { %964 = vmatpush3.bf16.msra.mxu0 %v1107_v51  ;;  %983 = vmatprep.subr.bf16.mxu1 %v1278_v49  ;;  %v539_v62 = vld [vmem:[#allocation2] sm:$0x3]  ;;  %v1121_v6 = vld [vmem:[#allocation9] sm:$0xff]  }
 0x1b1   : > { %965 = vmatprep.subr.bf16.mxu0 %v1278_v49  ;;  %v913_v15 = vld [vmem:[%s1498_s5] ss:$0 sm:$0xff] }
 0x1b3   : > { %984 = vmatpush3.bf16.msra.mxu1 %v1115_v57 }
 0x1b4   : > { %966 = vmatpush3.bf16.msra.mxu0 %v1108_v52  ;;  %985 = vmatprep.subr.bf16.mxu1 %v1278_v49 }
 0x1b5   : > { %967 = vmatprep.subr.bf16.mxu0 %v1278_v49 }
 0x1b7   : > { %986 = vmatpush3.bf16.msra.mxu1 %v1116_v59 }
 0x1b8   : > { %968 = vmatpush3.bf16.msra.mxu0 %v1109_v53  ;;  %987 = vmatprep.subr.bf16.mxu1 %v1278_v49 }
 0x1b9   : > { %969 = vmatprep.subr.bf16.mxu0 %v1278_v49 }
 0x1bb   : > { %988 = vmatpush3.bf16.msra.mxu1 %v1117_v2 }
 0x1bc   : > { %970 = vmatpush3.bf16.msra.mxu0 %v1110_v54  ;;  %989 = vmatprep.subr.bf16.mxu1 %v1278_v49 }
 0x1bd   : > { %971 = vmatprep.subr.bf16.mxu0 %v1278_v49 }
 0x1bf   : > { %990 = vmatpush3.bf16.msra.mxu1 %v1118_v3 }
 0x1c0   : > { %972 = vmatpush3.bf16.msra.mxu0 %v1111_v56  ;;  %991 = vmatprep.subr.bf16.mxu1 %v1278_v49 }
 0x1c1   : > { %973 = vmatprep.subr.bf16.mxu0 %v1278_v49 }
 0x1c3   : > { %992 = vmatpush3.bf16.msra.mxu1 %v1119_v4 }
 0x1c4   : > { %974 = vmatpush3.bf16.msra.mxu0 %v1112_v58  ;;  %993 = vmatprep.subr.bf16.mxu1 %v1278_v49 }
 0x1c5   : > { %975 = vmatprep.subr.bf16.mxu0 %v1278_v49 }
 0x1c7   : > { %994 = vmatpush3.bf16.msra.mxu1 %v1120_v5 }
 0x1c8   : > { %976 = vmatpush3.bf16.msra.mxu0 %v1113_v60  ;;  %995 = vmatprep.subr.bf16.mxu1 %v1278_v49 }
 0x1cb   : > { %996 = vmatpush3.bf16.msra.mxu1 %v1121_v6 }
 0x228   : > { %v543_v61 = vpop.permute.xlu0 %542 }
 0x229   : > { %1122 = vrcp.f32 %v543_v61 }
 0x236   : > { %v1123_v63 = vpop.eup %1122 }
 0x237   : > { %v546_v0 = vmul.f32 %v1123_v63, %v539_v62 }
 0x239   : > { %v547_v1 = vpack.c.bf16 %v546_v0, %v546_v0 }
 0x23b   : > { %978 = vmatmul.mubr.bf16.vlgmr.msra.gmra.mxu0 %v547_v1 }
 0x2fb   : > { %v653_v8 = vpop.f32.mrf.mxu0 }
 0x2fc   : > { %v654_v9 = vadd.f32 %v904_v7, %v653_v8 }
 0x2fd   : > { %v979_v10 = vpop.f32.mrf.mxu0 }
 0x2fe   : > { %1124 = vtanh.f32 %v654_v9 }
 0x2ff   : > { %v656_v11 = vpop.f32.mrf.mxu0 }
 0x301   : > { %v980_v12 = vpop.f32.mrf.mxu0 }
 0x30b   : > { %v1125_v13 = vpop.eup %1124 }
 0x30c   : > { %v660_v14 = vpack.c.bf16 %v1125_v13, %v1125_v13 }
 0x30e   : > { %998 = vmatmul.mubr.bf16.vlgmr.msra.gmra.mxu1 %v660_v14 }
 0x3ce   : > { %v766_v16 = vpop.f32.mrf.mxu1 }
 0x3cf   : > { %v767_v17 = vadd.f32 %v913_v15, %v766_v16 }
 0x3d0   : > { %v999_v18 = vpop.f32.mrf.mxu1 }
 0x3d1   : > { %772 = vst [vmem:[#allocation10] sm:$0x3] %v767_v17 }
 0x3d2   : > { %v769_v19 = vpop.f32.mrf.mxu1 }
 0x3d4   : > { %v1000_v20 = vpop.f32.mrf.mxu1 }
 0x3d5 PF: > { %s1513_s19 = sadd.s32 4294967295, %s1260_s26   ;;  %s1280_s12 = smov [#allocation10]  }
 0x3d6   : > { %p1460_p12 = scmp.eq.s32.totalorder %s1513_s19, 1  ;;  %s782_s15 = sshll.u32 %s1280_s12, 4  ;;  %s783_s15 = int_to_ptr.vmem [resolvable:$true] %s782_s15 }
 0x3d7   : > { %s1178_s17 = scalar_lea.vmem %s783_s15, 32  ;;  %p1185_p11 = scmp.lt.s32.totalorder %s783_s15, %s783_s15 }
 0x3d8   : > { %p1179_p13 = scmp.ne.s32.totalorder %s783_s15, %s1178_s17  ;;  %p1186_p0 = scmp.lt.s32.totalorder %s1178_s17, %s1178_s17 }
 0x3da   : > { %p1180_p7 = pnand %p1179_p13, %p1460_p12  ;;  %p1187_p1 = por %p1186_p0, %p1185_p11 }
 0x3dc   : > { %p1181_p9 = pneg %p1180_p7 }
 0x3de   : > { %p1188_p4 = pnand %p1187_p1, %p1181_p9 }
 0x3e0   : > { %1191 = shalt.err (!%p1188_p4)
}
 0x3e1   : > { %1019 = dma.vmem_to_hbm [thread:$0]  (%p1460_p12), %s783_s15, 32, %s1499_s6, [#allocation6]  }
 0x3e2   : > { %1235 = dma.done.wait (%p1460_p12), [#allocation6], 32  }
 0x3e3   : > { %1237 = vsyncadd (%p1460_p12), [#allocation6], 4294967264 }
 0x3e4 PF: > { %s21_s26 = sadd.s32 1, %s1260_s26   ;;  %s1515_s21 = smov %s1244_s22 }
 0x3e5   : > { %p18_p2 = scmp.ge.s32.totalorder %s21_s26, 4   ;;  %s1516_s22 = smov %s1248_s23 }
 0x3e6   : > { %s1517_s23 = smov %s1374_s10  ;;  %s1518_s24 = smov %s1256_s25 }
 0x3e7   : > { %s1519_s25 = smov %s1521_s28  ;;  %20 = sbr.rel (!%p18_p2) target bundleno = 8 (0x8), region = 106 }
 0x3ec   :  { %795 = vsyncpa [#allocation5], 1 }
 0x3ed   :  { %797 = vsyncpa [#allocation5 + $0x1], 1 }
 0x3ee   :  { %798 = vsyncpa [#allocation8], 1 }
 0x3ef   :  { %799 = vsyncpa [#allocation6], 1 }
 0x3f0   :  { %801 = vsyncpa [#allocation6 + $0x1], 1 }

</bundles_post_ra>
